<compile_context>
chip_gen: v5e
topology: v5e:2x2
jax: 0.10.0
libtpu: 0.0.40
codegen_flags: <defaults>
</compile_context>

<pallas_src>
import math

import jax
import jax.numpy as jnp
from jax.experimental import pallas as pl
from jax.experimental.pallas import tpu as pltpu

BN_EPS = 1e-3


def linear_bn_relu_kernel(x_ref, wt_ref, gb_ref, o_ref, acc_ref):
    k = pl.program_id(1)

    @pl.when(k == 0)
    def _():
        acc_ref[...] = jnp.zeros_like(acc_ref)

    # Partial product for this (Din tile, Dout tile): bf16 in, f32 accumulate.
    acc_ref[...] += jnp.dot(
        x_ref[...], wt_ref[...], preferred_element_type=jnp.float32
    )

    @pl.when(k == pl.num_programs(1) - 1)
    def _():
        y = acc_ref[...]                                   # (N, tn) f32
        n = y.shape[0]
        inv_n = jnp.float32(1.0 / n)

        # Two-pass batch statistics (biased variance), per output feature.
        mean = jnp.sum(y, axis=0, keepdims=True) * inv_n   # (1, tn)
        centered = y - mean
        var = jnp.sum(centered * centered, axis=0, keepdims=True) * inv_n

        gb = gb_ref[...]                                   # (2, tn): [gamma; beta]
        gamma = gb[0:1, :]
        beta = gb[1:2, :]

        scale = gamma * jax.lax.rsqrt(var + BN_EPS)        # rsqrt -> EUP slot
        # Normalize + affine + ReLU: one mul + one add + one max per element.
        o_ref[...] = jnp.maximum(centered * scale + beta, 0.0).astype(o_ref.dtype)


def _tpu_topology():
    """Return (physical VMEM bytes per core, is-2-TensorCore-per-chip guess)."""
    vmem = 128 << 20
    try:
        info = pltpu.get_tpu_info()
        vmem = int(getattr(info, "vmem_capacity_bytes", vmem))
    except Exception:
        pass
    # v7x has 64 MiB VMEM per TensorCore and 2 TensorCores per chip; v5e/v6e
    # have 128 MiB and a single TC.
    multi_core = vmem <= (64 << 20)
    return vmem, multi_core


def _pick_tiles(n, d_in, d_out, *, multi_core, budget_bytes,
                x_bytes, w_bytes, o_bytes):
    """Pick (tk, tn) tiles for the Din (reduction) and Dout (feature) axes."""
    # Reduction tile: keep the streamed (tk, tn) W^T block a few MiB so it
    # double-buffers even on v7x; take the whole axis when Din is small.
    tk = d_in
    if d_in > 1024:
        for cand in (1024, 512, 256, 128):
            if d_in % cand == 0:
                tk = cand
                break

    def vmem_est(tn):
        return (2 * n * tk * x_bytes        # x tile, double-buffered
                + 2 * tk * tn * w_bytes     # W^T tile, double-buffered
                + 2 * 2 * tn * 4            # packed gamma/beta, double-buffered
                + 2 * n * tn * o_bytes      # output tile, double-buffered
                + 3 * n * tn * 4)           # f32 accumulator + finalize temps

    # Lane-dense feature-tile candidates, largest first; full width always legal.
    cands = sorted(
        {d_out} | {c for c in (4096, 2048, 1024, 512, 256, 128)
                   if c < d_out and d_out % c == 0},
        reverse=True)

    def ok_cores(tn):
        # On 2-TC chips keep >= 2 independent feature tiles so both cores work.
        return (not multi_core) or d_out < 256 or (d_out // tn) >= 2

    for tn in cands:
        if ok_cores(tn) and vmem_est(tn) <= budget_bytes:
            return tk, tn
    for tn in reversed(cands):                 # smallest first, relax budget
        if ok_cores(tn):
            return tk, tn
    return tk, cands[-1]


def linear_block_forward(x, wt, gb, *, out_dtype=None):
    """x: (N, Din) f32/bf16; wt: (Din, Dout) bf16 pre-transposed weight;
    gb: (2, Dout) packed [gamma; beta].

    Returns ReLU(BatchNorm1d(x @ W^T)) with per-batch BN statistics, identical
    to Linear(bias) -> BN -> ReLU (the bias cancels under batch-stat BN).
    """
    n, d_in = x.shape
    d_in_w, d_out = wt.shape
    assert d_in_w == d_in
    out_dtype = x.dtype if out_dtype is None else out_dtype

    # Cast activations to the weight dtype (bf16): halves the x stream and
    # hits the native MXU ingest path; accumulation stays f32 in-kernel.
    x_lp = x.astype(wt.dtype) if x.dtype != wt.dtype else x

    vmem_phys, multi_core = _tpu_topology()
    budget_bytes = (38 << 20) if vmem_phys <= (64 << 20) else (96 << 20)

    x_bytes = jnp.dtype(x_lp.dtype).itemsize
    w_bytes = jnp.dtype(wt.dtype).itemsize
    o_bytes = jnp.dtype(out_dtype).itemsize

    tk, tn = _pick_tiles(n, d_in, d_out, multi_core=multi_core,
                         budget_bytes=budget_bytes,
                         x_bytes=x_bytes, w_bytes=w_bytes, o_bytes=o_bytes)
    assert d_out % tn == 0 and d_in % tk == 0

    est = (2 * n * tk * x_bytes + 2 * tk * tn * w_bytes + 2 * 2 * tn * 4
           + 2 * n * tn * o_bytes + 3 * n * tn * 4)
    vmem_limit = int(min(budget_bytes, max(16 << 20, 2 * est)))

    grid = (d_out // tn, d_in // tk)
    return pl.pallas_call(
        linear_bn_relu_kernel,
        out_shape=jax.ShapeDtypeStruct((n, d_out), out_dtype),
        grid_spec=pltpu.PrefetchScalarGridSpec(
            num_scalar_prefetch=0,
            grid=grid,
            in_specs=[
                # x tile over the reduction axis (full batch resident).
                pl.BlockSpec((n, tk), lambda j, k: (0, k)),
                # W^T tile: the only large streamed input (bf16).
                pl.BlockSpec((tk, tn), lambda j, k: (k, j)),
                # Packed [gamma; beta] tile.
                pl.BlockSpec((2, tn), lambda j, k: (0, j)),
            ],
            out_specs=pl.BlockSpec((n, tn), lambda j, k: (0, j)),
            scratch_shapes=[pltpu.VMEM((n, tn), jnp.float32)],
        ),
        compiler_params=pltpu.CompilerParams(
            dimension_semantics=("parallel", "arbitrary"),
            vmem_limit_bytes=vmem_limit,
        ),
    )(x_lp, wt, gb)


def init_linear_block_params(key, input_size, output_size,
                             init_mode="kaiming_uniform", init_scale=1.0):
    """Re-implementation of fc_init_ + init_param_ (+ BN affine params).

    Returns (wt, b, gb): weight pre-transposed to (Din, Dout) and stored in
    bf16, linear bias (always zero under these inits), and the packed
    (2, Dout) [gamma; beta] slab (packed once here, not per forward call).
    """
    k_w, k_kw = jax.random.split(key)

    # fc_init_: truncated normal std=0.01, bias=0
    w = 0.01 * jax.random.truncated_normal(
        k_w, -2.0, 2.0, (output_size, input_size), dtype=jnp.float32)
    b = jnp.zeros((output_size,), dtype=jnp.float32)

    if init_mode == "fc_init":
        pass
    elif init_mode == "kaiming_uniform":
        # kaiming_uniform_(fan_in, relu): bound = sqrt(2) * sqrt(3 / fan_in)
        fan_in = input_size
        bound = math.sqrt(2.0) * math.sqrt(3.0 / fan_in)
        w = jax.random.uniform(
            k_kw, (output_size, input_size), dtype=jnp.float32,
            minval=-bound, maxval=bound) * init_scale
    else:
        # TODO(synk): remaining init_modes from init_methods not needed here.
        raise NotImplementedError(init_mode)

    wt = w.T.astype(jnp.bfloat16)             # pre-transposed, bf16 in HBM

    gamma = jnp.ones((output_size,), dtype=jnp.float32)
    beta = jnp.zeros((output_size,), dtype=jnp.float32)
    gb = jnp.stack([gamma, beta], axis=0)     # (2, Dout), packed once at init
    return wt, b, gb


def reference_forward(x, wt_bf16, b, gamma, beta):
    # Full Linear (with bias) -> BN(batch stats) -> ReLU, straightforward math,
    # using the same bf16-rounded operands the kernel sees (f32 accumulation).
    xb = x.astype(jnp.bfloat16).astype(jnp.float32)
    wb = wt_bf16.astype(jnp.float32)
    y = xb @ wb + b
    mean = jnp.mean(y, axis=0, keepdims=True)
    var = jnp.mean((y - mean) ** 2, axis=0, keepdims=True)
    z = (y - mean) / jnp.sqrt(var + BN_EPS) * gamma + beta
    return jnp.maximum(z, 0.0)


if __name__ == "__main__":
    key = jax.random.PRNGKey(0)
    k_x, k_p = jax.random.split(key)

    N, D_IN, D_OUT = 8, 32, 256
    x = jax.random.normal(k_x, (N, D_IN), dtype=jnp.float32)
    wt, b, gb = init_linear_block_params(
        k_p, D_IN, D_OUT, init_mode="kaiming_uniform", init_scale=1.0)

    out = linear_block_forward(x, wt, gb)
    out = jax.block_until_ready(out)

    ref = reference_forward(x, wt, b, gb[0], gb[1])
    assert out.shape == (N, D_OUT)
    assert out.dtype == x.dtype
    max_err = float(jnp.max(jnp.abs(out - ref)))
    assert jnp.allclose(out, ref, atol=1e-3, rtol=1e-3), (
        f"mismatch vs reference, max abs err {max_err}")

    print("KERNEL_OK")
</pallas_src>

<mosaic_0001>
module attributes {stable_mosaic.version = 11 : i64} {
  func.func @linear_bn_relu_kernel(%arg0: i32, %arg1: i32, %arg2: memref<8x32xbf16, #tpu.memory_space<vmem>>, %arg3: memref<32x256xbf16, #tpu.memory_space<vmem>>, %arg4: memref<2x256xf32, #tpu.memory_space<vmem>>, %arg5: memref<8x256xf32, #tpu.memory_space<vmem>>, %arg6: memref<8x256xf32, #tpu.memory_space<vmem>>) attributes {dimension_semantics = [#tpu.dimension_semantics<parallel>, #tpu.dimension_semantics<arbitrary>], iteration_bounds = array<i64: 1, 1>, scalar_prefetch = 0 : i64, scratch_operands = 1 : i64, tpu.core_type = #tpu.core_type<tc>, window_params = [{transform_indices = @transform_0, window_bounds = array<i64: 8, 32>}, {transform_indices = @transform_1, window_bounds = array<i64: 32, 256>}, {transform_indices = @transform_2, window_bounds = array<i64: 2, 256>}, {transform_indices = @transform_3, window_bounds = array<i64: 8, 256>}]} {
    %c0_i32 = arith.constant 0 : i32
    %0 = arith.cmpi eq, %arg1, %c0_i32 : i32
    %1 = arith.extui %0 : i1 to i32
    %c0_i32_0 = arith.constant 0 : i32
    %2 = arith.cmpi ne, %1, %c0_i32_0 : i32
    scf.if %2 {
      %cst_10 = arith.constant 0.000000e+00 : f32
      %12 = vector.broadcast %cst_10 : f32 to vector<8x256xf32>
      %c0_11 = arith.constant 0 : index
      %c0_12 = arith.constant 0 : index
      %13 = vector.load %arg6[%c0_11, %c0_12] : memref<8x256xf32, #tpu.memory_space<vmem>>, vector<8x256xf32>
      tpu.vector_store %arg6[%c0_11, %c0_12], %12 {strides = array<i32>} : memref<8x256xf32, #tpu.memory_space<vmem>>, vector<8x256xf32>,
    } else {
    }
    %c0 = arith.constant 0 : index
    %c0_1 = arith.constant 0 : index
    %3 = vector.load %arg6[%c0, %c0_1] : memref<8x256xf32, #tpu.memory_space<vmem>>, vector<8x256xf32>
    %c0_2 = arith.constant 0 : index
    %c0_3 = arith.constant 0 : index
    %4 = vector.load %arg2[%c0_2, %c0_3] : memref<8x32xbf16, #tpu.memory_space<vmem>>, vector<8x32xbf16>
    %c0_4 = arith.constant 0 : index
    %c0_5 = arith.constant 0 : index
    %5 = vector.load %arg3[%c0_4, %c0_5] : memref<32x256xbf16, #tpu.memory_space<vmem>>, vector<32x256xbf16>
    %cst = arith.constant dense<0.000000e+00> : vector<8x256xf32>
    %6 = tpu.matmul %4, %5, %cst {dimension_numbers = #tpu.dot_dimension_numbers<[1], [0], [0], [1], [0, 0, 1, 1], [], []>} : vector<8x32xbf16>, vector<32x256xbf16>, vector<8x256xf32> -> vector<8x256xf32>
    %7 = arith.addf %3, %6 : vector<8x256xf32>
    %c0_6 = arith.constant 0 : index
    %c0_7 = arith.constant 0 : index
    %8 = vector.load %arg6[%c0_6, %c0_7] : memref<8x256xf32, #tpu.memory_space<vmem>>, vector<8x256xf32>
    tpu.vector_store %arg6[%c0_6, %c0_7], %7 {strides = array<i32>} : memref<8x256xf32, #tpu.memory_space<vmem>>, vector<8x256xf32>,
    %c0_i32_8 = arith.constant 0 : i32
    %9 = arith.cmpi eq, %arg1, %c0_i32_8 : i32
    %10 = arith.extui %9 : i1 to i32
    %c0_i32_9 = arith.constant 0 : i32
    %11 = arith.cmpi ne, %10, %c0_i32_9 : i32
    scf.if %11 {
      %c0_10 = arith.constant 0 : index
      %c0_11 = arith.constant 0 : index
      %12 = vector.load %arg6[%c0_10, %c0_11] : memref<8x256xf32, #tpu.memory_space<vmem>>, vector<8x256xf32>
      %cst_12 = arith.constant dense<0.000000e+00> : vector<256xf32>
      %13 = vector.multi_reduction <add>, %12, %cst_12 [0] : vector<8x256xf32> to vector<256xf32>
      %14 = vector.shape_cast %13 : vector<256xf32> to vector<1x256xf32>
      %cst_13 = arith.constant 1.250000e-01 : f32
      %15 = vector.broadcast %cst_13 : f32 to vector<1x256xf32>
      %16 = arith.mulf %14, %15 : vector<1x256xf32>
      %17 = vector.broadcast %16 : vector<1x256xf32> to vector<8x256xf32>
      %18 = arith.subf %12, %17 : vector<8x256xf32>
      %19 = arith.mulf %18, %18 : vector<8x256xf32>
      %cst_14 = arith.constant dense<0.000000e+00> : vector<256xf32>
      %20 = vector.multi_reduction <add>, %19, %cst_14 [0] : vector<8x256xf32> to vector<256xf32>
      %21 = vector.shape_cast %20 : vector<256xf32> to vector<1x256xf32>
      %cst_15 = arith.constant 1.250000e-01 : f32
      %22 = vector.broadcast %cst_15 : f32 to vector<1x256xf32>
      %23 = arith.mulf %21, %22 : vector<1x256xf32>
      %c0_16 = arith.constant 0 : index
      %c0_17 = arith.constant 0 : index
      %24 = vector.load %arg4[%c0_16, %c0_17] : memref<2x256xf32, #tpu.memory_space<vmem>>, vector<2x256xf32>
      %25 = vector.extract_strided_slice %24 {offsets = [0, 0], sizes = [1, 256], strides = [1, 1]} : vector<2x256xf32> to vector<1x256xf32>
      %26 = vector.extract_strided_slice %24 {offsets = [1, 0], sizes = [1, 256], strides = [1, 1]} : vector<2x256xf32> to vector<1x256xf32>
      %cst_18 = arith.constant 1.000000e-03 : f32
      %27 = vector.broadcast %cst_18 : f32 to vector<1x256xf32>
      %28 = arith.addf %23, %27 : vector<1x256xf32>
      %29 = math.rsqrt %28 : vector<1x256xf32>
      %30 = arith.mulf %25, %29 : vector<1x256xf32>
      %31 = vector.broadcast %30 : vector<1x256xf32> to vector<8x256xf32>
      %32 = arith.mulf %18, %31 : vector<8x256xf32>
      %33 = vector.broadcast %26 : vector<1x256xf32> to vector<8x256xf32>
      %34 = arith.addf %32, %33 : vector<8x256xf32>
      %cst_19 = arith.constant 0.000000e+00 : f32
      %35 = vector.broadcast %cst_19 : f32 to vector<8x256xf32>
      %36 = arith.maximumf %34, %35 : vector<8x256xf32>
      %c0_20 = arith.constant 0 : index
      %c0_21 = arith.constant 0 : index
      %37 = vector.load %arg5[%c0_20, %c0_21] : memref<8x256xf32, #tpu.memory_space<vmem>>, vector<8x256xf32>
      tpu.vector_store %arg5[%c0_20, %c0_21], %36 {strides = array<i32>} : memref<8x256xf32, #tpu.memory_space<vmem>>, vector<8x256xf32>,
    } else {
    }
    return
  }
  func.func @transform_0(%arg0: i32, %arg1: i32) -> (i32, i32) {
    %c0_i32 = arith.constant 0 : i32
    %c0_i32_0 = arith.constant 0 : i32
    return %c0_i32, %arg1 : i32, i32
  }
  func.func @transform_1(%arg0: i32, %arg1: i32) -> (i32, i32) {
    %c0_i32 = arith.constant 0 : i32
    return %arg1, %arg0 : i32, i32
  }
  func.func @transform_2(%arg0: i32, %arg1: i32) -> (i32, i32) {
    %c0_i32 = arith.constant 0 : i32
    %c0_i32_0 = arith.constant 0 : i32
    return %c0_i32, %arg0 : i32, i32
  }
  func.func @transform_3(%arg0: i32, %arg1: i32) -> (i32, i32) {
    %c0_i32 = arith.constant 0 : i32
    %c0_i32_0 = arith.constant 0 : i32
    return %c0_i32, %arg0 : i32, i32
  }
}

</mosaic_0001>

<bundles_post_ra>
// kernel: tpu_custom_call.1
= control target key start
LH: loop header
LB: loop body
LE: loop exit
PB: predicated region body
PF: predicated region fallthrough
CT: control target
= control target key end

     0   :  { %8 = vsyncpa [#allocation4], 0  ;;  %s405_s0 = inlined_call_operand.hbm [shape: bf16[8,32], index: 0, kind: input, shape index: {}]   ;;  %s406_s1 = inlined_call_operand.hbm [shape: bf16[32,256], index: 1, kind: input, shape index: {}]   ;;  %s407_s2 = inlined_call_operand.hbm [shape: f32[2,256], index: 2, kind: input, shape index: {}]   ;;  %s408_s3 = inlined_call_operand.hbm [shape: f32[8,256], index: 3, kind: output, shape index: {}]  }
   0x1   :  { %9 = vsyncpa [#allocation7], 0  ;;  %s26_s14 = sshll.u32 %s406_s1, 4  ;;  %s27_s14 = int_to_ptr.hbm [resolvable:$true] %s26_s14 }
   0x2   :  { %10 = vsyncpa [#allocation5], 0  ;;  %s367_s15 = smov [#allocation6]   ;;  %s16_s19 = sshll.u32 %s405_s0, 4  ;;  %s17_s19 = int_to_ptr.hbm [resolvable:$true] %s16_s19 }
   0x3   :  { %s28_s16 = sshll.u32 %s367_s15, 4  ;;  %s368_s20 = smov 128   ;;  %s29_s16 = int_to_ptr.vmem [resolvable:$true] %s28_s16 }
   0x4   :  { %s369_s21 = smov 8   ;;  %s370_s22 = smov [#allocation3]  }
   0x5   :  { %34 = dma.hbm_to_vmem [thread:$0]  %s27_s14, 512, %s29_s16, [#allocation7], %s368_s20, %s368_s20, %s369_s21  }
   0x6   :  { %s18_s23 = sshll.u32 %s370_s22, 4  ;;  %s40_s26 = sshll.u32 %s407_s2, 4  ;;  %s19_s23 = int_to_ptr.vmem [resolvable:$true] %s18_s23  ;;  %s41_s26 = int_to_ptr.hbm [resolvable:$true] %s40_s26 }
   0x7   :  { %21 = dma.hbm_to_vmem [thread:$0]  %s17_s19, 64, %s19_s23, [#allocation4]  }
   0x8   :  { %s371_s1 = smov [#allocation8]  }
   0x9   :  { %s42_s27 = sshll.u32 %s371_s1, 4  ;;  %s43_s27 = int_to_ptr.vmem [resolvable:$true] %s42_s27 }
   0xa   :  { %45 = dma.hbm_to_vmem [thread:$0]  %s41_s26, 64, %s43_s27, [#allocation7]  }
   0xb   :  { %361 = dma.done.wait [#allocation4], 64  }
   0xc   :  { %362 = vsyncadd [#allocation4], 4294967232 }
   0xd   :  { %363 = dma.done.wait [#allocation7], 576  }
   0xe   :  { %364 = vsyncadd [#allocation7], 4294966720  ;;  %v243_v0 = vld [vmem:[#allocation6 + $0x10] sm:$0xf]  ;;  %v254_v1 = vld [vmem:[#allocation6 + $0x14] sm:$0xf0] }
   0xf   :  { %v253_v2 = vld [vmem:[#allocation6 + $0x14] sm:$0xf]  ;;  %v244_v3 = vor.u32 %v254_v1, %v243_v0  ;;  %v245_v4 = vld [vmem:[#allocation6 + $0x18] sm:$0xf0]  ;;  %v235_v5 = vld [vmem:[#allocation6] sm:$0xf] }
  0x10   :  { %v252_v6 = vld [vmem:[#allocation6 + $0x4] sm:$0xf0]  ;;  %v248_v7 = vor.u32 %v253_v2, %v245_v4  ;;  %v251_v8 = vld [vmem:[#allocation6 + $0x4] sm:$0xf]  ;;  %v237_v9 = vld [vmem:[#allocation6 + $0x8] sm:$0xf0] }
  0x11   :  { %102 = vmatpush.bf16.msra.mxu0 %v244_v3  ;;  %v236_v10 = vor.u32 %v252_v6, %v235_v5  ;;  %v240_v11 = vor.u32 %v251_v8, %v237_v9  ;;  %v67_v12 = vld [vmem:[#allocation3] sm:$0xf]  ;;  %vm92_vm0 = vcmask 261120   ;;  %vm189_vm6 = vcmask 1041408   ;;  %v163_v0 = vld [vmem:[#allocation8] sm:$0xf] }
  0x12   :  { %115 = vmatpush.bf16.msra.mxu1 %v248_v7  ;;  %v204_v5 = vperm.slane %v163_v0, 3  ;;  %v203_v6 = vperm.slane %v163_v0, 1  ;;  %s372_s0 = smov [#allocation9]   ;;  %s222_s30 = sshll.u32 %s408_s3, 4  ;;  %s223_s30 = int_to_ptr.hbm [resolvable:$true] %s222_s30 }
  0x13   :  { %s220_s2 = sshll.u32 %s372_s0, 4  ;;  %s221_s2 = int_to_ptr.vmem [resolvable:$true] %s220_s2 }
  0x15   :  { %103 = vmatpush.bf16.msra.mxu0 %v236_v10  ;;  %v208_v10 = vperm.slane %v204_v5, 1 }
  0x16   :  { %116 = vmatpush.bf16.msra.mxu1 %v240_v11 }
  0x18   :  { %249 = vmatmul.msk.bf16.vlgmr.msra.gmra.mxu0 %vm92_vm0, %v67_v12 }
  0x19   :  { %250 = vmatmul.msk.bf16.vlgmr.msra.gmra.mxu1 %vm92_vm0, %v67_v12  ;;  %v207_v12 = vperm.slane %v203_v6, 1 }
  0x95   :  { %v105_v13 = vpop.f32.mrf.mxu0 }
  0x96   :  { %v131_v14 = vrot.slane %v105_v13, 4  ;;  %v118_v15 = vpop.f32.mrf.mxu1 }
  0x97   :  { %v137_v16 = vrot.slane %v118_v15, 4 }
  0x98   :  { %v132_v17 = vadd.f32 %v131_v14, %v105_v13 }
  0x99   :  { %v138_v18 = vadd.f32 %v137_v16, %v118_v15 }
  0x9a   :  { %v133_v19 = vrot.slane %v132_v17, 2 }
  0x9b   :  { %v139_v20 = vrot.slane %v138_v18, 2 }
  0x9c   :  { %v134_v21 = vadd.f32 %v133_v19, %v132_v17 }
  0x9d   :  { %v140_v22 = vadd.f32 %v139_v20, %v138_v18  ;;  %v107_v23 = vpop.f32.mrf.mxu0 }
  0x9e   :  { %v135_v24 = vrot.slane %v134_v21, 1  ;;  %v120_v25 = vpop.f32.mrf.mxu1 }
  0x9f   :  { %v141_v26 = vrot.slane %v140_v22, 1 }
  0xa0   :  { %v136_v27 = vadd.f32 %v135_v24, %v134_v21 }
  0xa1   :  { %v142_v28 = vadd.f32 %v141_v26, %v140_v22 }
  0xa2   :  { %v143_v29 = vmul.f32 0.125, %v136_v27 }
  0xa3   :  { %v144_v30 = vmul.f32 0.125, %v142_v28 }
  0xa4   :  { %v145_v31 = vsub.f32 %v105_v13, %v143_v29 }
  0xa5   :  { %v146_v32 = vsub.f32 %v118_v15, %v144_v30 }
  0xa6   :  { %v147_v33 = vmul.f32 %v145_v31, %v145_v31 }
  0xa7   :  { %v148_v34 = vmul.f32 %v146_v32, %v146_v32 }
  0xa8   :  { %v149_v35 = vrot.slane %v147_v33, 4 }
  0xa9   :  { %v155_v36 = vrot.slane %v148_v34, 4 }
  0xaa   :  { %v150_v37 = vadd.f32 %v149_v35, %v147_v33 }
  0xab   :  { %v156_v38 = vadd.f32 %v155_v36, %v148_v34 }
  0xac   :  { %v151_v39 = vrot.slane %v150_v37, 2 }
  0xad   :  { %v157_v40 = vrot.slane %v156_v38, 2 }
  0xae   :  { %v152_v41 = vadd.f32 %v151_v39, %v150_v37 }
  0xaf   :  { %v158_v42 = vadd.f32 %v157_v40, %v156_v38 }
  0xb0   :  { %v153_v43 = vrot.slane %v152_v41, 1 }
  0xb1   :  { %v159_v44 = vrot.slane %v158_v42, 1 }
  0xb2   :  { %v154_v45 = vadd.f32 %v153_v43, %v152_v41 }
  0xb3   :  { %v160_v46 = vadd.f32 %v159_v44, %v158_v42 }
  0xb4   :  { %v161_v47 = vmul.f32 0.125, %v154_v45 }
  0xb5   :  { %v162_v48 = vmul.f32 0.125, %v160_v46 }
  0xb6   :  { %v164_v49 = vadd.f32 0.001, %v161_v47 }
  0xb7   :  { %v165_v50 = vadd.f32 0.001, %v162_v48 }
  0xb8   :  { %261 = vrsqrt.f32 %v164_v49  ;;  %vm172_vm5 = vweird.f32 %v164_v49 }
  0xb9   :  { %263 = vrsqrt.f32 %v165_v50  ;;  %vm182_vm3 = vweird.f32 %v165_v50 }
  0xbe   :  { %v262_v51 = vpop.eup %261 }
  0xbf   :  { %v264_v52 = vpop.eup %263  ;;  %v167_v53 = vmul.f32 %v262_v51, %v164_v49  ;;  %vm173_vm2 = vweird.f32 %v262_v51 }
  0xc0   :  { %v177_v54 = vmul.f32 %v264_v52, %v165_v50  ;;  %vm183_vm1 = vweird.f32 %v264_v52  ;;  %vm174_vm7 = vmor %vm172_vm5, %vm173_vm2 }
  0xc1   :  { %v168_v55 = vmul.f32 %v262_v51, %v167_v53  ;;  %vm184_vm4 = vmor %vm182_vm3, %vm183_vm1 }
  0xc2   :  { %v178_v56 = vmul.f32 %v264_v52, %v177_v54 }
  0xc3   :  { %v169_v57 = vmul.f32 0.5, %v168_v55 }
  0xc4   :  { %v179_v58 = vmul.f32 0.5, %v178_v56 }
  0xc5   :  { %v170_v59 = vsub.f32 1.5, %v169_v57 }
  0xc6   :  { %v180_v60 = vsub.f32 1.5, %v179_v58 }
  0xc7   :  { %v171_v61 = vmul.f32 %v262_v51, %v170_v59 }
  0xc8   :  { %v181_v62 = vmul.f32 %v264_v52, %v180_v60 }
  0xc9   :  { %v175_v2 = vsel %vm174_vm7, %v262_v51, %v171_v61 }
  0xca   :  { %v185_v63 = vsel %vm184_vm4, %v264_v52, %v181_v62 }
  0xcb   :  { %v188_v1 = vrot.slane %v185_v63, 6 }
  0xcd   :  { %v190_v3 = vsel %vm189_vm6, %v175_v2, %v188_v1 }
  0xce   :  { %v192_v4 = vmul.f32 %v190_v3, %v163_v0 }
  0xd0   :  { %v194_v7 = vperm.slane %v192_v4, 0  ;;  %v195_v8 = vperm.slane %v192_v4, 2 }
  0xd2   :  { %v199_v9 = vperm.slane %v195_v8, 0  ;;  %v198_v11 = vperm.slane %v194_v7, 0 }
  0xd4   :  { %v201_v13 = vmul.f32 %v199_v9, %v146_v32  ;;  %v200_v14 = vmul.f32 %v198_v11, %v145_v31 }
  0xd6   :  { %v210_v15 = vadd.f32 %v208_v10, %v201_v13  ;;  %v209_v16 = vadd.f32 %v207_v12, %v200_v14 }
  0xd8   :  { %v211_v17 = vmax.f32 %v209_v16, 0.0  ;;  %v212_v18 = vmax.f32 %v210_v15, 0.0 }
  0xda   :  { %213 = vst [vmem:[#allocation9] sm:$0xff] %v211_v17 }
  0xdb   :  { %214 = vst [vmem:[#allocation9 + $0x8] sm:$0xff] %v212_v18 }
  0xdc   :  { %225 = dma.vmem_to_hbm [thread:$0]  %s221_s2, 256, %s223_s30, [#allocation5]  }
  0xdd   :  { %365 = dma.done.wait [#allocation5], 256  }
  0xde   :  { %366 = vsyncadd [#allocation5], 4294967040 }
  0xdf   :  { %230 = vsyncpa [#allocation4], 1 }
  0xe0   :  { %231 = vsyncpa [#allocation7], 1 }
  0xe1   :  { %232 = vsyncpa [#allocation5], 1 }

</bundles_post_ra>
